<compile_context>
chip_gen: v7x
topology: tpu7x:2x2x1
jax: 0.10.0
libtpu: 0.0.40
codegen_flags: <defaults>
</compile_context>

<pallas_src>
import functools

import jax
import jax.numpy as jnp
from jax import lax
from jax.experimental import pallas as pl
from jax.experimental.pallas import tpu as pltpu


def _pair_rowsum_kernel(emb_ref, other_ref, mask_ref, s_ref, acc_ref, *, margin):
    """One (TM, TN) tile of s_i = sum_j mask[i, j] * exp(margin - d[i, j])."""
    col = pl.program_id(1)

    @pl.when(col == 0)
    def _():
        acc_ref[...] = jnp.zeros_like(acc_ref)

    x = emb_ref[...]                                    # (TM, Dp) f32
    y = other_ref[...]                                  # (TN, Dp) f32
    mask_f = mask_ref[...].astype(jnp.float32)          # (TM, TN), int8 -> f32

    d_feat = x.shape[1]
    # d2[i, j] = ||x_i||^2 + ||y_j||^2 - 2 <x_i, y_j>  (gram on the MXU).
    gram = lax.dot_general(x, y, (((1,), (1,)), ((), ())),
                           preferred_element_type=jnp.float32)          # (TM, TN)
    xx = jnp.sum(x * x, axis=-1, keepdims=True)                         # (TM, 1)
    # Row vector of ||y_j||^2 via a matmul against ones (no in-kernel transpose).
    yy_row = lax.dot_general(jnp.ones((1, d_feat), jnp.float32), y * y,
                             (((1,), (1,)), ((), ())),
                             preferred_element_type=jnp.float32)        # (1, TN)
    d = jnp.sqrt(jnp.maximum(xx + yy_row - 2.0 * gram, 0.0))            # (TM, TN)

    # Masked negative-pair terms: plain multiply instead of compare+select.
    neg_exp = mask_f * jnp.exp(margin - d)                              # (TM, TN)
    acc_ref[...] += jnp.sum(neg_exp, axis=-1, keepdims=True)            # (TM, 1)

    @pl.when(col == pl.num_programs(1) - 1)
    def _():
        s_ref[...] = acc_ref[...]


def _epilogue_kernel(x1_ref, y2_ref, s1_ref, s2_ref, out_ref):
    """ap = ||x_i - y_{i+N}||; j = log(s1 + s2) + ap; NaN-skip relu^2 mean / 2."""
    diff = x1_ref[...] - y2_ref[...]                                    # (N, Dp)
    ap = jnp.sqrt(jnp.sum(diff * diff, axis=-1, keepdims=True))         # (N, 1)
    j = jnp.log(s1_ref[...] + s2_ref[...]) + ap                         # (N, 1)

    # PyTorch skips NaN terms before stacking; emulate with a validity mask.
    # TODO(synk): an all-NaN batch makes torch.stack([]) raise; here it yields NaN.
    valid = jnp.logical_not(jnp.isnan(j))
    sq = jnp.where(valid, jnp.square(jnp.maximum(j, 0.0)), 0.0)
    cnt = jnp.sum(valid.astype(jnp.float32))
    out_ref[0] = jnp.sum(sq) / cnt * 0.5


def _pick_tile(total, cap, align):
    """Largest multiple of `align` that divides `total` and is <= cap; else full dim."""
    if total <= cap:
        return total
    t = cap - cap % align
    while t >= align:
        if total % t == 0:
            return t
        t -= align
    return total


def smooth_metric_loss_v2(embeddings, neg_mask, margin, other_embeddings=None):
    """JAX/Pallas equivalent of SmoothMetricLossV2.forward."""
    if other_embeddings is None:
        other_embeddings = embeddings
    two_n = embeddings.shape[0]
    n = two_n // 2
    d_feat = embeddings.shape[1]

    emb = embeddings.astype(jnp.float32)
    other = other_embeddings.astype(jnp.float32)

    # Lane-dense features: zero-pad D to a multiple of 128 (distances unchanged).
    d_pad = max(128, -(-d_feat // 128) * 128)
    if d_pad != d_feat:
        emb = jnp.pad(emb, ((0, 0), (0, d_pad - d_feat)))
        other = jnp.pad(other, ((0, 0), (0, d_pad - d_feat)))

    # Keep the mask int8: ~4x less HBM traffic than a wrapper-side f32 cast.
    mask_i8 = neg_mask.astype(jnp.int8)

    # Tile caps sized for the smallest VMEM (v7x: 64 MiB physical / 32 MiB scoped).
    tm = _pick_tile(two_n, 256, 32)    # 32-aligned sublanes (int8 mask tiling)
    tn = _pick_tile(two_n, 512, 128)   # lane dim: multiple of 128 (or full dim)

    s = pl.pallas_call(
        functools.partial(_pair_rowsum_kernel, margin=float(margin)),
        out_shape=jax.ShapeDtypeStruct((two_n, 1), jnp.float32),
        grid_spec=pltpu.PrefetchScalarGridSpec(
            num_scalar_prefetch=0,
            grid=(two_n // tm, two_n // tn),
            in_specs=[
                pl.BlockSpec((tm, d_pad), lambda i, j: (i, 0)),   # embeddings rows
                pl.BlockSpec((tn, d_pad), lambda i, j: (j, 0)),   # other rows (cols)
                pl.BlockSpec((tm, tn), lambda i, j: (i, j)),      # int8 neg mask
            ],
            out_specs=pl.BlockSpec((tm, 1), lambda i, j: (i, 0)),
            scratch_shapes=[pltpu.VMEM((tm, 1), jnp.float32)],
        ),
        compiler_params=pltpu.CompilerParams(
            dimension_semantics=("parallel", "arbitrary"),
            vmem_limit_bytes=32 * 1024 * 1024,
        ),
    )(emb, other, mask_i8)

    # Tiny O(N) epilogue: positive-pair distances + final loss reduction.
    out = pl.pallas_call(
        _epilogue_kernel,
        out_shape=jax.ShapeDtypeStruct((1,), jnp.float32),
        in_specs=[pl.BlockSpec(memory_space=pltpu.MemorySpace.VMEM)] * 4,
        out_specs=pl.BlockSpec(memory_space=pltpu.MemorySpace.SMEM),
    )(emb[:n], other[n:], s[:n], s[n:])
    return out[0]


def _reference(emb, other, neg_mask_bool, margin):
    """Pure-JAX reference mirroring the PyTorch forward."""
    d = jnp.sqrt(jnp.maximum(
        jnp.sum((emb[:, None, :] - other[None, :, :]) ** 2, axis=-1), 0.0))
    n = emb.shape[0] // 2
    s = jnp.sum(jnp.where(neg_mask_bool, jnp.exp(margin - d), 0.0), axis=-1)
    ap = d[jnp.arange(n), jnp.arange(n) + n]
    j = jnp.log(s[:n] + s[n:]) + ap
    valid = jnp.logical_not(jnp.isnan(j))
    sq = jnp.where(valid, jnp.maximum(j, 0.0) ** 2, 0.0)
    return jnp.sum(sq) / jnp.sum(valid) / 2.0


if __name__ == "__main__":
    # Small shapes consistent with the module: 2N embeddings of dim D.
    N, D = 8, 32
    MARGIN = 1.0
    key = jax.random.PRNGKey(0)
    k_emb, k_mask = jax.random.split(key)

    embeddings = jax.random.normal(k_emb, (2 * N, D), dtype=jnp.float32)

    # Boolean negative mask: random, excluding self and the positive pair.
    neg_mask = jax.random.bernoulli(k_mask, 0.5, (2 * N, 2 * N))
    idx = jnp.arange(2 * N)
    self_or_pos = (idx[:, None] == idx[None, :]) | \
                  (idx[None, :] == ((idx[:, None] + N) % (2 * N)))
    neg_mask = jnp.logical_and(neg_mask, jnp.logical_not(self_or_pos))

    loss = smooth_metric_loss_v2(embeddings, neg_mask, MARGIN)
    loss = jax.block_until_ready(loss)

    ref = _reference(embeddings, embeddings, neg_mask, MARGIN)
    assert jnp.isfinite(loss), "kernel produced non-finite loss"
    assert jnp.allclose(loss, ref, rtol=1e-3, atol=1e-5), (loss, ref)

    print("KERNEL_OK")
</pallas_src>

<mosaic_0001>
module attributes {stable_mosaic.version = 11 : i64} {
  func.func @_pair_rowsum_kernel(%arg0: i32, %arg1: i32, %arg2: memref<16x128xf32, #tpu.memory_space<vmem>>, %arg3: memref<16x128xf32, #tpu.memory_space<vmem>>, %arg4: memref<16x16xi8, #tpu.memory_space<vmem>>, %arg5: memref<16x1xf32, #tpu.memory_space<vmem>>, %arg6: memref<16x1xf32, #tpu.memory_space<vmem>>) attributes {dimension_semantics = [#tpu.dimension_semantics<parallel>, #tpu.dimension_semantics<arbitrary>], iteration_bounds = array<i64: 1, 1>, scalar_prefetch = 0 : i64, scratch_operands = 1 : i64, tpu.core_type = #tpu.core_type<tc>, window_params = [{transform_indices = @transform_0, window_bounds = array<i64: 16, 128>}, {transform_indices = @transform_1, window_bounds = array<i64: 16, 128>}, {transform_indices = @transform_2, window_bounds = array<i64: 16, 16>}, {transform_indices = @transform_3, window_bounds = array<i64: 16, 1>}]} {
    %c0_i32 = arith.constant 0 : i32
    %0 = arith.cmpi eq, %arg1, %c0_i32 : i32
    %1 = arith.extui %0 : i1 to i32
    %c0_i32_0 = arith.constant 0 : i32
    %2 = arith.cmpi ne, %1, %c0_i32_0 : i32
    scf.if %2 {
      %cst_19 = arith.constant 0.000000e+00 : f32
      %35 = vector.broadcast %cst_19 : f32 to vector<16x1xf32>
      %c0_20 = arith.constant 0 : index
      %c0_21 = arith.constant 0 : index
      %36 = vector.load %arg6[%c0_20, %c0_21] : memref<16x1xf32, #tpu.memory_space<vmem>>, vector<16x1xf32>
      tpu.vector_store %arg6[%c0_20, %c0_21], %35 {strides = array<i32>} : memref<16x1xf32, #tpu.memory_space<vmem>>, vector<16x1xf32>,
    } else {
    }
    %c0 = arith.constant 0 : index
    %c0_1 = arith.constant 0 : index
    %3 = vector.load %arg2[%c0, %c0_1] : memref<16x128xf32, #tpu.memory_space<vmem>>, vector<16x128xf32>
    %c0_2 = arith.constant 0 : index
    %c0_3 = arith.constant 0 : index
    %4 = vector.load %arg3[%c0_2, %c0_3] : memref<16x128xf32, #tpu.memory_space<vmem>>, vector<16x128xf32>
    %c0_4 = arith.constant 0 : index
    %c0_5 = arith.constant 0 : index
    %5 = vector.load %arg4[%c0_4, %c0_5] : memref<16x16xi8, #tpu.memory_space<vmem>>, vector<16x16xi8>
    %6 = arith.sitofp %5 : vector<16x16xi8> to vector<16x16xf32>
    %cst = arith.constant dense<0.000000e+00> : vector<16x16xf32>
    %7 = tpu.matmul %3, %4, %cst {dimension_numbers = #tpu.dot_dimension_numbers<[1], [1], [0], [0], [0, 0, 1, 0], [], []>} : vector<16x128xf32>, vector<16x128xf32>, vector<16x16xf32> -> vector<16x16xf32>
    %8 = arith.mulf %3, %3 : vector<16x128xf32>
    %cst_6 = arith.constant dense<0.000000e+00> : vector<16xf32>
    %9 = vector.multi_reduction <add>, %8, %cst_6 [1] : vector<16x128xf32> to vector<16xf32>
    %10 = vector.shape_cast %9 : vector<16xf32> to vector<16x1xf32>
    %cst_7 = arith.constant 1.000000e+00 : f32
    %11 = vector.broadcast %cst_7 : f32 to vector<1x128xf32>
    %12 = arith.mulf %4, %4 : vector<16x128xf32>
    %cst_8 = arith.constant dense<0.000000e+00> : vector<1x16xf32>
    %13 = tpu.matmul %11, %12, %cst_8 {dimension_numbers = #tpu.dot_dimension_numbers<[1], [1], [0], [0], [0, 0, 1, 0], [], []>} : vector<1x128xf32>, vector<16x128xf32>, vector<1x16xf32> -> vector<1x16xf32>
    %14 = vector.broadcast %10 : vector<16x1xf32> to vector<16x16xf32>
    %15 = vector.broadcast %13 : vector<1x16xf32> to vector<16x16xf32>
    %16 = arith.addf %14, %15 : vector<16x16xf32>
    %cst_9 = arith.constant 2.000000e+00 : f32
    %17 = vector.broadcast %cst_9 : f32 to vector<16x16xf32>
    %18 = arith.mulf %17, %7 : vector<16x16xf32>
    %19 = arith.subf %16, %18 : vector<16x16xf32>
    %cst_10 = arith.constant 0.000000e+00 : f32
    %20 = vector.broadcast %cst_10 : f32 to vector<16x16xf32>
    %21 = arith.maximumf %19, %20 : vector<16x16xf32>
    %22 = math.sqrt %21 : vector<16x16xf32>
    %cst_11 = arith.constant 1.000000e+00 : f32
    %23 = vector.broadcast %cst_11 : f32 to vector<16x16xf32>
    %24 = arith.subf %23, %22 : vector<16x16xf32>
    %25 = math.exp %24 : vector<16x16xf32>
    %26 = arith.mulf %6, %25 : vector<16x16xf32>
    %c0_12 = arith.constant 0 : index
    %c0_13 = arith.constant 0 : index
    %27 = vector.load %arg6[%c0_12, %c0_13] : memref<16x1xf32, #tpu.memory_space<vmem>>, vector<16x1xf32>
    %cst_14 = arith.constant dense<0.000000e+00> : vector<16xf32>
    %28 = vector.multi_reduction <add>, %26, %cst_14 [1] : vector<16x16xf32> to vector<16xf32>
    %29 = vector.shape_cast %28 : vector<16xf32> to vector<16x1xf32>
    %30 = arith.addf %27, %29 : vector<16x1xf32>
    %c0_15 = arith.constant 0 : index
    %c0_16 = arith.constant 0 : index
    %31 = vector.load %arg6[%c0_15, %c0_16] : memref<16x1xf32, #tpu.memory_space<vmem>>, vector<16x1xf32>
    tpu.vector_store %arg6[%c0_15, %c0_16], %30 {strides = array<i32>} : memref<16x1xf32, #tpu.memory_space<vmem>>, vector<16x1xf32>,
    %c0_i32_17 = arith.constant 0 : i32
    %32 = arith.cmpi eq, %arg1, %c0_i32_17 : i32
    %33 = arith.extui %32 : i1 to i32
    %c0_i32_18 = arith.constant 0 : i32
    %34 = arith.cmpi ne, %33, %c0_i32_18 : i32
    scf.if %34 {
      %c0_19 = arith.constant 0 : index
      %c0_20 = arith.constant 0 : index
      %35 = vector.load %arg6[%c0_19, %c0_20] : memref<16x1xf32, #tpu.memory_space<vmem>>, vector<16x1xf32>
      %c0_21 = arith.constant 0 : index
      %c0_22 = arith.constant 0 : index
      %36 = vector.load %arg5[%c0_21, %c0_22] : memref<16x1xf32, #tpu.memory_space<vmem>>, vector<16x1xf32>
      tpu.vector_store %arg5[%c0_21, %c0_22], %35 {strides = array<i32>} : memref<16x1xf32, #tpu.memory_space<vmem>>, vector<16x1xf32>,
    } else {
    }
    return
  }
  func.func @transform_0(%arg0: i32, %arg1: i32) -> (i32, i32) {
    %c0_i32 = arith.constant 0 : i32
    %c0_i32_0 = arith.constant 0 : i32
    return %arg0, %c0_i32 : i32, i32
  }
  func.func @transform_1(%arg0: i32, %arg1: i32) -> (i32, i32) {
    %c0_i32 = arith.constant 0 : i32
    %c0_i32_0 = arith.constant 0 : i32
    return %arg1, %c0_i32 : i32, i32
  }
  func.func @transform_2(%arg0: i32, %arg1: i32) -> (i32, i32) {
    %c0_i32 = arith.constant 0 : i32
    return %arg0, %arg1 : i32, i32
  }
  func.func @transform_3(%arg0: i32, %arg1: i32) -> (i32, i32) {
    %c0_i32 = arith.constant 0 : i32
    %c0_i32_0 = arith.constant 0 : i32
    return %arg0, %c0_i32 : i32, i32
  }
}

</mosaic_0001>

<bundles_post_ra>
// kernel: tpu_custom_call.1
= control target key start
LH: loop header
LB: loop body
LE: loop exit
PB: predicated region body
PF: predicated region fallthrough
CT: control target
= control target key end

     0   :  { %8 = vsyncpa [#allocation4], 0  ;;  %s436_s0 = inlined_call_operand.hbm [shape: f32[16,128], index: 0, kind: input, shape index: {}]   ;;  %s437_s1 = inlined_call_operand.hbm [shape: f32[16,128], index: 1, kind: input, shape index: {}]   ;;  %s438_s2 = inlined_call_operand.vmem [shape: s8[16,16], index: 2, kind: input, shape index: {}]   ;;  %s439_s3 = inlined_call_operand.vmem [shape: f32[16,1], index: 3, kind: output, shape index: {}]  }
   0x1   :  { %9 = vsyncpa [#allocation6], 0  ;;  %s369_s12 = smov [#allocation3]   ;;  %s321_s16 = scalar_lea.hbm %s436_s0, 256 }
   0x2   :  { %s15_s13 = sshll.u32 %s369_s12, 4  ;;  %p322_p0 = scmp.ne.s32.totalorder %s436_s0, %s321_s16  ;;  %s16_s13 = int_to_ptr.vmem [resolvable:$true] %s15_s13 }
   0x3   :  { %p325_p1 = scmp.lt.u32.totalorder %s321_s16, %s436_s0 }
   0x5   :  { %p327_p2 = pnand %p325_p1, %p322_p0 }
   0x7   :  { %330 = shalt.err (!%p327_p2)
}
   0x8   :  { %s331_s21 = scalar_lea.vmem %s16_s13, 256  ;;  %p336_p4 = scmp.lt.s32.totalorder %s16_s13, %s16_s13 }
   0x9   :  { %p332_p3 = scmp.ne.s32.totalorder %s16_s13, %s331_s21  ;;  %p337_p5 = scmp.lt.s32.totalorder %s331_s21, %s331_s21 }
   0xb   :  { %p338_p6 = por %p337_p5, %p336_p4 }
   0xd   :  { %p339_p7 = pnand %p338_p6, %p332_p3 }
   0xf   :  { %342 = shalt.err (!%p339_p7)
}
  0x10   :  { %s370_s22 = smov 128   ;;  %s371_s23 = smov 8  }
  0x11   :  { %21 = dma.hbm_to_vmem [thread:$0]  %s436_s0, 256, %s16_s13, [#allocation4], %s370_s22, %s370_s22, %s371_s23  }
  0x12   :  { %s372_s26 = smov [#allocation5]   ;;  %s343_s30 = scalar_lea.hbm %s437_s1, 256 }
  0x13   :  { %s27_s27 = sshll.u32 %s372_s26, 4  ;;  %p344_p8 = scmp.ne.s32.totalorder %s437_s1, %s343_s30  ;;  %s28_s27 = int_to_ptr.vmem [resolvable:$true] %s27_s27 }
  0x14   :  { %p347_p9 = scmp.lt.u32.totalorder %s343_s30, %s437_s1 }
  0x16   :  { %p349_p10 = pnand %p347_p9, %p344_p8 }
  0x18   :  { %352 = shalt.err (!%p349_p10)
}
  0x19   :  { %s353_s8 = scalar_lea.vmem %s28_s27, 256  ;;  %p358_p12 = scmp.lt.s32.totalorder %s28_s27, %s28_s27 }
  0x1a   :  { %p354_p11 = scmp.ne.s32.totalorder %s28_s27, %s353_s8  ;;  %p359_p13 = scmp.lt.s32.totalorder %s353_s8, %s353_s8 }
  0x1c   :  { %p360_p0 = por %p359_p13, %p358_p12 }
  0x1e   :  { %p361_p1 = pnand %p360_p0, %p354_p11 }
  0x20   :  { %364 = shalt.err (!%p361_p1)
}
  0x21   :  { %33 = dma.hbm_to_vmem [thread:$0]  %s437_s1, 256, %s28_s27, [#allocation6], %s370_s22, %s370_s22, %s371_s23  }
  0x22   :  { %365 = dma.done.wait [#allocation4], 256  }
  0x23   :  { %366 = vsyncadd [#allocation4], 4294967040 }
  0x24   :  { %367 = dma.done.wait [#allocation6], 256  }
  0x25   :  { %368 = vsyncadd [#allocation6], 4294967040  ;;  %vm46_vm0 = vcmask 7168   ;;  %v373_v0 = vmov 0.0|0.0   ;;  %v374_v1 = vmov 0.0   ;;  %vm375_vm1 = vmmov 0  }
  0x26   :  { %302 = vmatprep.subr.bf16.mxu1 %v373_v0  ;;  %47 = vst.msk [vmem:[#allocation2] sm:$0xff] %vm46_vm0, %v374_v1  ;;  %48 = vst.msk [vmem:[#allocation2 + $0x8] sm:$0xff] %vm46_vm0, %v374_v1  ;;  %295 = vmatprep.mubr.msk.f32.mxu1 %vm375_vm1, %v374_v1  ;;  %v51_v2 = vld [vmem:[#allocation5] sm:$0xff]  ;;  %v52_v3 = vld [vmem:[#allocation5 + $0x8] sm:$0xff]  ;;  %v376_v12 = vmov 1.0   ;;  %v212_v13 = vlaneseq  ;;  %vm248_vm6 = vcmask 130048  }
  0x27   :  { %v49_v4 = vld [vmem:[#allocation3] sm:$0xff]  ;;  %v298_v5 = vpack.c.bf16 %v52_v3, %v51_v2  ;;  %v140_v6 = vmul.f32 %v51_v2, %v51_v2  ;;  %v141_v7 = vmul.f32 %v52_v3, %v52_v3  ;;  %v50_v9 = vld [vmem:[#allocation3 + $0x8] sm:$0xff] }
  0x28   :  { %288 = vmatprep.mubr.f32.mxu0 %v49_v4  ;;  %v134_v8 = vmul.f32 %v49_v4, %v49_v4  ;;  %v135_v11 = vmul.f32 %v50_v9, %v50_v9  ;;  %v213_v15 = vshrl.u32 %v212_v13, 7  ;;  %v274_v45 = vld [vmem:[%s438_s2] sm:$0xf]  }
  0x29   :  { %299 = vmatprep.subr.bf16.mxu0 %v298_v5  ;;  %v303_v10 = vpack.c.bf16 %v141_v7, %v140_v6  ;;  %v275_v46 = vunpack.c.0.s8 %v274_v45  ;;  %v276_v47 = vunpack.c.1.s8 %v274_v45 }
  0x2a   :  { %136 = vadd.xlane.f32.xlu0 %v134_v8  ;;  %301 = vmatpush3.bf16.xpose.msra.mxu0 %v298_v5  ;;  %v214_v16 = vsub.s32 0, %v213_v15 }
  0x2b   :  { %304 = vmatpush3.bf16.xpose.msra.mxu1 %v303_v10  ;;  %v57_v48 = vcvt.s32.f32 %v275_v46  ;;  %v58_v49 = vcvt.s32.f32 %v276_v47 }
  0x2d   :  { %v246_v56 = vld [vmem:[#allocation2] sm:$0xff]  ;;  %v247_v59 = vld [vmem:[#allocation2 + $0x8] sm:$0xff] }
  0x2e   :  { %138 = vadd.xlane.f32.xlu0 %v135_v11 }
  0x31   :  { %289 = vmatmul.mubr.f32.vlgmr.msra.gmra.mrb[0].mxu0 %v50_v9 }
  0x32   :  { %296 = vmatmul.mubr.f32.vlgmr.msra.gmra.mrb[0].mxu1 %v376_v12 }
  0xb7   :  { %v137_v14 = vpop.xlane.xlu0 %136 }
  0xbb   :  { %v139_v18 = vpop.xlane.xlu0 %138 }
 0x104   :  { %v290_v17 = vpop.f32.mrb[0].mxu0 }
 0x105   :  { %v208_v19 = vpop.f32.mrb[0].mxu1  ;;  %v125_v20 = vpop.f32.mrb[1].mxu0  ;;  %v219_v21 = vmul.f32 2.0, %v290_v17 }
 0x106   :  { %v215_v22 = vrot.slane %v208_v19, %v214_v16  ;;  %v218_v23 = vmul.f32 2.0, %v125_v20  ;;  %v297_v24 = vpop.f32.mrb[1].mxu1 }
 0x108   :  { %v216_v25 = vadd.f32 %v215_v22, %v137_v14  ;;  %v217_v26 = vadd.f32 %v215_v22, %v139_v18 }
 0x10a   :  { %v220_v27 = vsub.f32 %v216_v25, %v218_v23  ;;  %v221_v28 = vsub.f32 %v217_v26, %v219_v21 }
 0x10c   :  { %v222_v29 = vmax.f32 %v220_v27, 0.0  ;;  %v223_v30 = vmax.f32 %v221_v28, 0.0 }
 0x10e   :  { %313 = vrsqrt.f32 %v222_v29  ;;  %vm226_vm2 = vcmp.eq.f32.partialorder %v222_v29, inf  ;;  %v229_v35 = vand.u32 2147483648, %v222_v29  ;;  %vm228_vm3 = vcmp.eq.f32.partialorder %v222_v29, 0.0 }
 0x10f   :  { %315 = vrsqrt.f32 %v223_v30  ;;  %vm233_vm4 = vcmp.eq.f32.partialorder %v223_v30, inf  ;;  %v236_v37 = vand.u32 2147483648, %v223_v30  ;;  %vm235_vm5 = vcmp.eq.f32.partialorder %v223_v30, 0.0 }
 0x118   :  { %v314_v31 = vpop.eup %313 }
 0x119   :  { %v316_v32 = vpop.eup %315  ;;  %v225_v33 = vmul.f32 %v314_v31, %v222_v29 }
 0x11a   :  { %v232_v34 = vmul.f32 %v316_v32, %v223_v30 }
 0x11b   :  { %v227_v36 = vsel %vm226_vm2, %v222_v29, %v225_v33 }
 0x11c   :  { %v230_v38 = vsel %vm228_vm3, %v229_v35, %v227_v36  ;;  %v234_v39 = vsel %vm233_vm4, %v223_v30, %v232_v34 }
 0x11d   :  { %v238_v40 = vsub.f32 1.0, %v230_v38  ;;  %v237_v41 = vsel %vm235_vm5, %v236_v37, %v234_v39 }
 0x11e   :  { %v239_v42 = vsub.f32 1.0, %v237_v41 }
 0x11f   :  { %v240_v43 = vmul.f32 1.442695, %v238_v40 }
 0x120   :  { %v242_v44 = vmul.f32 1.442695, %v239_v42 }
 0x121   :  { %317 = vpow2.f32 %v240_v43 }
 0x122   :  { %319 = vpow2.f32 %v242_v44 }
 0x12b   :  { %v318_v50 = vpop.eup %317 }
 0x12c   :  { %v320_v51 = vpop.eup %319  ;;  %v244_v52 = vmul.f32 %v318_v50, %v57_v48 }
 0x12d   :  { %v245_v54 = vmul.f32 %v320_v51, %v58_v49 }
 0x12e   :  { %v249_v53 = vsel %vm248_vm6, %v244_v52, 0.0 }
 0x12f   :  { %250 = vadd.xlane.f32.xlu1 %v249_v53  ;;  %v252_v55 = vsel %vm248_vm6, %v245_v54, 0.0 }
 0x133   :  { %253 = vadd.xlane.f32.xlu1 %v252_v55 }
 0x1bc   :  { %v251_v57 = vpop.xlane.xlu1 %250 }
 0x1bd   :  { %v255_v58 = vadd.f32 %v251_v57, %v246_v56 }
 0x1bf   :  { %258 = vst.msk [vmem:[#allocation2] sm:$0xff] %vm46_vm0, %v255_v58 }
 0x1c0   :  { %v254_v60 = vpop.xlane.xlu1 %253 }
 0x1c1   :  { %v256_v61 = vadd.f32 %v254_v60, %v247_v59 }
 0x1c3   :  { %259 = vst.msk [vmem:[#allocation2 + $0x8] sm:$0xff] %vm46_vm0, %v256_v61 }
 0x1c6   :  { %v263_v62 = vld [vmem:[#allocation2] sm:$0xff] }
 0x1c7   :  { %265 = vst.msk [vmem:[%s439_s3] sm:$0xff] %vm46_vm0, %v263_v62 }
 0x1ca   :  { %v264_v63 = vld [vmem:[#allocation2 + $0x8] sm:$0xff] }
 0x1cb   :  { %266 = vst.msk [vmem:[%s439_s3 + $0x8] sm:$0xff] %vm46_vm0, %v264_v63 }
 0x1cc   :  { %271 = vsyncpa [#allocation4], 1 }
 0x1cd   :  { %272 = vsyncpa [#allocation6], 1 }

</bundles_post_ra>
